<compile_context>
chip_gen: v7x
topology: tpu7x:2x2x1
jax: 0.10.0
libtpu: 0.0.40
codegen_flags: <defaults>
</compile_context>

<pallas_src>
import functools

import jax
import jax.numpy as jnp
from jax.experimental import pallas as pl
from jax.experimental.pallas import tpu as pltpu


_VMEM_LIMIT_BYTES = 48 * 1024 * 1024   # scoped-VMEM request (safe on v5e/v6e/v7x)
_VMEM_BUF_BUDGET = 24 * 1024 * 1024    # budget for double-buffered block DMAs
_MAX_TILE_N = 2048


def _round_up(v, m):
    return ((v + m - 1) // m) * m


def _elementwise_bce(x_ref, y_ref, eps):
    """-(y*log(clamp(sigmoid(x),eps)) + (1-y)*log(clamp(1-sigmoid(x),eps)))."""
    x = x_ref[...].astype(jnp.float32)
    y = y_ref[...].astype(jnp.float32)
    p = 1.0 / (1.0 + jnp.exp(-x))                       # sigmoid
    log_p = jnp.log(jnp.maximum(p, eps))
    log_q = jnp.log(jnp.maximum(1.0 - p, eps))
    # y*log_p + (1-y)*log_q == log_q + y*(log_p - log_q)  (one fewer full mul)
    return -(log_q + y * (log_p - log_q))


def _bce_partial_sum_kernel(x_ref, y_ref, out_ref, *, eps, n_rows, tile_n,
                            mask_rows):
    """Per-tile partial sums of the element-wise loss, folded to (8, C)."""
    loss = _elementwise_bce(x_ref, y_ref, eps)
    if mask_rows:
        # Zero out padded rows (only the last tile can be partial).
        row = (jax.lax.broadcasted_iota(jnp.int32, loss.shape, 0)
               + pl.program_id(0) * tile_n)
        loss = jnp.where(row < n_rows, loss, 0.0)
    # Fold rows into 8 sublane groups -> lane-dense (8, C) partial-sum block.
    out_ref[...] = jnp.sum(loss.reshape(tile_n // 8, 8, loss.shape[-1]), axis=0)


def _bce_elementwise_kernel(x_ref, y_ref, out_ref, *, eps):
    out_ref[...] = _elementwise_bce(x_ref, y_ref, eps)


def bce_with_logits(x, y, *, eps=1e-8, reduce="mean", tile_n=None):
    """JAX/Pallas equivalent of deepbiosphere Losses.BCE().forward(x, y)."""
    if reduce not in ("mean", "sum", "none"):
        raise NotImplementedError(reduce)

    N, C = x.shape
    assert y.shape == (N, C), (x.shape, y.shape)

    x_item = jnp.dtype(x.dtype).itemsize
    y_item = jnp.dtype(y.dtype).itemsize
    # Sublane multiple required by the narrowest dtype (f32->8, bf16->16, i8->32).
    mult = 32 // min(x_item, y_item)

    per_row_bytes = C * (x_item + y_item)
    if reduce == "none":
        per_row_bytes += C * 4                  # f32 output block also pipelined

    if tile_n is None:
        t = _VMEM_BUF_BUDGET // (2 * max(per_row_bytes, 1))
        t = min(t, _MAX_TILE_N)
        # Prefer >= 2 grid steps so v7x's two TensorCores can both be used.
        t = min(t, _round_up(max(-(-N // 2), 1), mult))
        tile_n = max(mult, (t // mult) * mult)
    else:
        tile_n = max(mult, _round_up(int(tile_n), mult))

    n_pad = _round_up(N, tile_n)
    grid = n_pad // tile_n

    if n_pad != N:
        x = jnp.pad(x, ((0, n_pad - N), (0, 0)))
        y = jnp.pad(y, ((0, n_pad - N), (0, 0)))

    compiler_params = pltpu.CompilerParams(
        dimension_semantics=("parallel",),
        vmem_limit_bytes=_VMEM_LIMIT_BYTES)

    in_specs = [pl.BlockSpec((tile_n, C), lambda i: (i, 0)),
                pl.BlockSpec((tile_n, C), lambda i: (i, 0))]

    if reduce == "none":
        kernel = functools.partial(_bce_elementwise_kernel, eps=eps)
        out = pl.pallas_call(
            kernel,
            out_shape=jax.ShapeDtypeStruct((n_pad, C), jnp.float32),
            grid_spec=pltpu.PrefetchScalarGridSpec(
                num_scalar_prefetch=0,
                grid=(grid,),
                in_specs=in_specs,
                out_specs=pl.BlockSpec((tile_n, C), lambda i: (i, 0)),
            ),
            compiler_params=compiler_params,
        )(x, y)
        return out[:N]

    kernel = functools.partial(
        _bce_partial_sum_kernel, eps=eps, n_rows=N, tile_n=tile_n,
        mask_rows=(n_pad != N))
    partials = pl.pallas_call(
        kernel,
        out_shape=jax.ShapeDtypeStruct((8 * grid, C), jnp.float32),
        grid_spec=pltpu.PrefetchScalarGridSpec(
            num_scalar_prefetch=0,
            grid=(grid,),
            in_specs=in_specs,
            out_specs=pl.BlockSpec((8, C), lambda i: (i, 0)),
        ),
        compiler_params=compiler_params,
    )(x, y)

    total = jnp.sum(partials)
    if reduce == "mean":
        return total / jnp.float32(N * C)
    return total


def _reference(x, y, eps=1e-8, reduce="mean"):
    """Pure-JAX mirror of the torch BCE.forward for validation."""
    x = x.astype(jnp.float32)
    y = y.astype(jnp.float32)
    p = 1.0 / (1.0 + jnp.exp(-x))
    loss = (y * jnp.log(jnp.maximum(p, eps))
            + (1.0 - y) * jnp.log(jnp.maximum(1.0 - p, eps)))
    neg = -loss
    if reduce == "mean":
        return jnp.mean(neg)
    if reduce == "sum":
        return jnp.sum(neg)
    return neg


if __name__ == "__main__":
    key = jax.random.PRNGKey(0)
    kx, ky, kx2, ky2 = jax.random.split(key, 4)

    # Small multi-label problem: N rows, C classes. N deliberately not a
    # multiple of 8 to exercise the padding + row-masking path.
    N, C = 13, 256
    x = 3.0 * jax.random.normal(kx, (N, C), dtype=jnp.float32)
    y = (jax.random.uniform(ky, (N, C)) < 0.1).astype(jnp.float32)

    out_mean = jax.block_until_ready(bce_with_logits(x, y, reduce="mean"))
    ref_mean = _reference(x, y, reduce="mean")
    assert jnp.allclose(out_mean, ref_mean, rtol=1e-5, atol=1e-5), (out_mean, ref_mean)

    out_sum = jax.block_until_ready(bce_with_logits(x, y, reduce="sum"))
    ref_sum = _reference(x, y, reduce="sum")
    assert jnp.allclose(out_sum, ref_sum, rtol=1e-4, atol=1e-3), (out_sum, ref_sum)

    out_none = jax.block_until_ready(bce_with_logits(x, y, reduce="none"))
    ref_none = _reference(x, y, reduce="none")
    assert out_none.shape == (N, C)
    assert jnp.allclose(out_none, ref_none, rtol=1e-5, atol=1e-5)

    # Multi-tile path with an explicit small tile (grid of 3, masked tail).
    N2 = 40
    x2 = 3.0 * jax.random.normal(kx2, (N2, C), dtype=jnp.float32)
    y2 = (jax.random.uniform(ky2, (N2, C)) < 0.2).astype(jnp.float32)
    out2 = jax.block_until_ready(bce_with_logits(x2, y2, reduce="mean", tile_n=16))
    ref2 = _reference(x2, y2, reduce="mean")
    assert jnp.allclose(out2, ref2, rtol=1e-5, atol=1e-5), (out2, ref2)

    # Reduced-precision inputs (bf16 logits + int8 multi-hot targets) are
    # accepted directly and upcast inside the kernel; compare loosely.
    out_lp = jax.block_until_ready(
        bce_with_logits(x2.astype(jnp.bfloat16), y2.astype(jnp.int8),
                        reduce="mean"))
    assert jnp.allclose(out_lp, ref2, rtol=5e-2, atol=5e-2), (out_lp, ref2)

    print("KERNEL_OK")
</pallas_src>

<mosaic_0001>
module attributes {stable_mosaic.version = 11 : i64} {
  func.func @_bce_partial_sum_kernel(%arg0: i32, %arg1: memref<8x256xf32, #tpu.memory_space<vmem>>, %arg2: memref<8x256xf32, #tpu.memory_space<vmem>>, %arg3: memref<8x256xf32, #tpu.memory_space<vmem>>) attributes {dimension_semantics = [#tpu.dimension_semantics<parallel>], iteration_bounds = array<i64: 2>, scalar_prefetch = 0 : i64, scratch_operands = 0 : i64, tpu.core_type = #tpu.core_type<tc>, window_params = [{transform_indices = @transform_0, window_bounds = array<i64: 8, 256>}, {transform_indices = @transform_1, window_bounds = array<i64: 8, 256>}, {transform_indices = @transform_2, window_bounds = array<i64: 8, 256>}]} {
    %c0 = arith.constant 0 : index
    %c0_0 = arith.constant 0 : index
    %0 = vector.load %arg1[%c0, %c0_0] : memref<8x256xf32, #tpu.memory_space<vmem>>, vector<8x256xf32>
    %c0_1 = arith.constant 0 : index
    %c0_2 = arith.constant 0 : index
    %1 = vector.load %arg2[%c0_1, %c0_2] : memref<8x256xf32, #tpu.memory_space<vmem>>, vector<8x256xf32>
    %cst = arith.constant 0.000000e+00 : f32
    %2 = vector.broadcast %cst : f32 to vector<8x256xf32>
    %3 = arith.subf %2, %0 : vector<8x256xf32>
    %4 = math.exp %3 : vector<8x256xf32>
    %cst_3 = arith.constant 1.000000e+00 : f32
    %5 = vector.broadcast %cst_3 : f32 to vector<8x256xf32>
    %6 = arith.addf %5, %4 : vector<8x256xf32>
    %cst_4 = arith.constant 1.000000e+00 : f32
    %7 = vector.broadcast %cst_4 : f32 to vector<8x256xf32>
    %8 = arith.divf %7, %6 : vector<8x256xf32>
    %cst_5 = arith.constant 9.99999993E-9 : f32
    %9 = vector.broadcast %cst_5 : f32 to vector<8x256xf32>
    %10 = arith.maximumf %8, %9 : vector<8x256xf32>
    %11 = math.log %10 : vector<8x256xf32>
    %cst_6 = arith.constant 1.000000e+00 : f32
    %12 = vector.broadcast %cst_6 : f32 to vector<8x256xf32>
    %13 = arith.subf %12, %8 : vector<8x256xf32>
    %cst_7 = arith.constant 9.99999993E-9 : f32
    %14 = vector.broadcast %cst_7 : f32 to vector<8x256xf32>
    %15 = arith.maximumf %13, %14 : vector<8x256xf32>
    %16 = math.log %15 : vector<8x256xf32>
    %17 = arith.subf %11, %16 : vector<8x256xf32>
    %18 = arith.mulf %1, %17 : vector<8x256xf32>
    %19 = arith.addf %16, %18 : vector<8x256xf32>
    %cst_8 = arith.constant 0.000000e+00 : f32
    %20 = vector.broadcast %cst_8 : f32 to vector<8x256xf32>
    %21 = arith.subf %20, %19 : vector<8x256xf32>
    %22 = tpu.iota {dimensions = array<i32: 0>} : vector<8x256xi32>
    %c8_i32 = arith.constant 8 : i32
    %23 = arith.muli %arg0, %c8_i32 : i32
    %24 = vector.broadcast %23 : i32 to vector<8x256xi32>
    %25 = arith.addi %22, %24 : vector<8x256xi32>
    %c13_i32 = arith.constant 13 : i32
    %26 = vector.broadcast %c13_i32 : i32 to vector<8x256xi32>
    %27 = arith.cmpi slt, %25, %26 : vector<8x256xi32>
    %cst_9 = arith.constant 0.000000e+00 : f32
    %28 = vector.broadcast %cst_9 : f32 to vector<8x256xf32>
    %29 = arith.select %27, %21, %28 : vector<8x256xi1>, vector<8x256xf32>
    %30 = vector.shape_cast %29 : vector<8x256xf32> to vector<1x8x256xf32>
    %cst_10 = arith.constant dense<0.000000e+00> : vector<8x256xf32>
    %31 = vector.multi_reduction <add>, %30, %cst_10 [0] : vector<1x8x256xf32> to vector<8x256xf32>
    %c0_11 = arith.constant 0 : index
    %c0_12 = arith.constant 0 : index
    %32 = vector.load %arg3[%c0_11, %c0_12] : memref<8x256xf32, #tpu.memory_space<vmem>>, vector<8x256xf32>
    tpu.vector_store %arg3[%c0_11, %c0_12], %31 {strides = array<i32>} : memref<8x256xf32, #tpu.memory_space<vmem>>, vector<8x256xf32>,
    return
  }
  func.func @transform_0(%arg0: i32) -> (i32, i32) {
    %c0_i32 = arith.constant 0 : i32
    %c0_i32_0 = arith.constant 0 : i32
    return %arg0, %c0_i32 : i32, i32
  }
  func.func @transform_1(%arg0: i32) -> (i32, i32) {
    %c0_i32 = arith.constant 0 : i32
    %c0_i32_0 = arith.constant 0 : i32
    return %arg0, %c0_i32 : i32, i32
  }
  func.func @transform_2(%arg0: i32) -> (i32, i32) {
    %c0_i32 = arith.constant 0 : i32
    %c0_i32_0 = arith.constant 0 : i32
    return %arg0, %c0_i32 : i32, i32
  }
}

</mosaic_0001>

<bundles_post_ra>
// kernel: tpu_custom_call.1
= control target key start
LH: loop header
LB: loop body
LE: loop exit
PB: predicated region body
PF: predicated region fallthrough
CT: control target
= control target key end

     0   :  { %7 = vsyncpa [#allocation3], 0  ;;  %s814_s0 = inlined_call_operand.hbm [shape: f32[16,256], index: 0, kind: input, shape index: {}]   ;;  %s815_s1 = inlined_call_operand.hbm [shape: f32[16,256], index: 1, kind: input, shape index: {}]   ;;  %s816_s2 = inlined_call_operand.hbm [shape: f32[16,256], index: 2, kind: output, shape index: {}]  }
   0x1   :  { %9 = vsyncpa [#allocation3 + $0x1], 0 }
   0x2   :  { %10 = vsyncpa [#allocation6], 0 }
   0x3   :  { %12 = vsyncpa [#allocation6 + $0x1], 0 }
   0x4   :  { %13 = vsyncpa [#allocation4], 0 }
   0x5   :  { %15 = vsyncpa [#allocation4 + $0x1], 0  ;;  %s595_s9 = smov 0   ;;  %s597_s10 = smov 0  }
   0x6   :  { %s599_s11 = smov 0   ;;  %s601_s12 = smov 0  }
   0x7 LB: > { %s616_s13 = sadd.s32 4294967295, %s575_s12   ;;  %s356_s14 = sadd.s32 4294967294, %s575_s12   ;;  %s575_s12 = sphi %s601_s12, %s835_s12   ;;  %s571_s11 = sphi %s599_s11, %s834_s11   ;;  %s567_s10 = sphi %s597_s10, %s833_s10   ;;  %s563_s9 = sphi %s595_s9, %s832_s9  }
   0x8   : > { %s620_s15 = sadd.s32 1, %s575_s12   ;;  %s28_s16 = sadd.s32 1, %s571_s11 }
   0x9   : > { %s25_s17 = ssub.s32 %s575_s12, %s620_s15  ;;  %p35_p0 = scmp.ne.s32.totalorder %s571_s11, %s567_s10 }
   0xa   : > { %p26_p1 = scmp.eq.s32.totalorder %s25_s17, 0  ;;  %p36_p2 = scmp.eq.s32.totalorder %s575_s12, 0 }
   0xb   : > { %p41_p3 = scmp.ne.s32.totalorder %s567_s10, %s563_s9  ;;  %p42_p4 = scmp.eq.s32.totalorder %s616_s13, 0 }
   0xc   : > { %s632_s18 = scalar_select %p26_p1, %s571_s11, %s28_s16  }
   0xd   : > { %p634_p5 = por %p36_p2, %p35_p0  ;;  %p638_p6 = por %p42_p4, %p41_p3 }
   0xe   : > { %p91_p7 = scmp.eq.s32.totalorder %s616_s13, 1  ;;  %p97_p8 = scmp.eq.s32.totalorder %s356_s14, 1 }
   0xf   : > { %s820_s20 = scalar_select %p638_p6, 1, 0 }
  0x10   : > { %p395_p10 = scmp.lt.s32.totalorder %s575_s12, 2  ;;  %p645_p11 = por %p91_p7, %p35_p0 }
  0x11   : > { %p649_p12 = por %p97_p8, %p41_p3  ;;  %s654_s23 = sand.u32 1, %s571_s11  }
  0x12   : > { %s821_s21 = scalar_select %p645_p11, 1, 0 }
  0x13   : > { %s822_s22 = scalar_select %p649_p12, 1, 0 }
  0x14   : > { %s375_s24 = sshll.u32 %s575_s12, 8  ;;  %s359_s25 = sshll.u32 %s654_s23, 4 }
  0x15   : > { %s663_s28 = scalar_lea.hbm %s814_s0, %s375_s24  ;;  %s121_s29 = scalar_lea.vmem [#allocation2], %s359_s25 }
  0x16   : > { %s129_s30 = sshll.u32 %s121_s29, 4  ;;  %p669_p13 = pnand %p395_p10, %p634_p5  ;;  %s673_s30 = int_to_ptr.vmem [resolvable:$true] %s129_s30 }
  0x17   : > { %s118_s4 = scalar_lea.sflag [#allocation3], %s654_s23  ;;  %s445_s5 = scalar_lea.hbm %s663_s28, 256 }
  0x18   : > { %p446_p2 = scmp.ne.s32.totalorder %s663_s28, %s445_s5  ;;  %p447_p3 = pneg %p669_p13 }
  0x19   : > { %s450_s8 = scalar_lea.hbm %s814_s0, 512  ;;  %p451_p5 = scmp.lt.u32.totalorder %s663_s28, %s814_s0 }
  0x1a   : > { %p448_p4 = pnand %p447_p3, %p446_p2  ;;  %p452_p8 = scmp.lt.u32.totalorder %s450_s8, %s445_s5 }
  0x1b   : > { %p454_p9 = scmp.lt.u32.totalorder %s445_s5, %s663_s28 }
  0x1c   : > { %p449_p7 = pneg %p448_p4  ;;  %p453_p10 = por %p452_p8, %p451_p5 }
  0x1e   : > { %p455_p0 = por %p454_p9, %p453_p10 }
  0x20   : > { %p456_p1 = pnand %p455_p0, %p449_p7 }
  0x22   : > { %459 = shalt.err (!%p456_p1)
}
  0x23   : > { %s460_s17 = scalar_lea.vmem %s673_s30, 256  ;;  %s577_s19 = smov [#allocation2]  }
  0x24   : > { %p461_p2 = scmp.ne.s32.totalorder %s673_s30, %s460_s17  ;;  %s465_s26 = sshll.u32 %s577_s19, 4  ;;  %s466_s26 = int_to_ptr.vmem [resolvable:$false] %s465_s26 }
  0x25   : > { %s467_s27 = scalar_lea.vmem %s466_s26, 512  ;;  %p468_p11 = scmp.lt.s32.totalorder %s673_s30, %s466_s26 }
  0x26   : > { %p463_p4 = pnand %p461_p2, %p447_p3  ;;  %p469_p5 = scmp.lt.s32.totalorder %s467_s27, %s460_s17 }
  0x28   : > { %p464_p12 = pneg %p463_p4  ;;  %p470_p8 = por %p469_p5, %p468_p11 }
  0x2a   : > { %p471_p9 = pnand %p470_p8, %p464_p12 }
  0x2c   : > { %474 = shalt.err (!%p471_p9)
}
  0x2d   : > { %387 = dma.hbm_to_vmem [thread:$0]  (!%p669_p13), %s663_s28, 256, %s673_s30, %s118_s4  }
  0x2e   : > { %p824_p0 = scmp.lt.s32.totalorder %s575_s12, 3  ;;  %p825_p1 = scmp.ge.s32.totalorder %s575_s12, 1 }
  0x2f   : > { %s716_s7 = scalar_lea.hbm %s815_s1, %s375_s24  ;;  %s140_s8 = scalar_lea.vmem [#allocation5], %s359_s25 }
  0x30   : > { %p707_p7 = pnand %p825_p1, %p824_p0  ;;  %s148_s14 = sshll.u32 %s140_s8, 4  ;;  %s149_s14 = int_to_ptr.vmem [resolvable:$true] %s148_s14 }
  0x31   : > { %s137_s28 = scalar_lea.sflag [#allocation6], %s654_s23  ;;  %s475_s30 = scalar_lea.hbm %s716_s7, 256 }
  0x32   : > { %s826_s29 = scalar_select %p707_p7, 1, 0 }
  0x33   : > { %p476_p11 = scmp.ne.s32.totalorder %s716_s7, %s475_s30  ;;  %s480_s24 = scalar_lea.hbm %s815_s1, 512 }
  0x34   : > { %p481_p2 = scmp.lt.u32.totalorder %s716_s7, %s815_s1  ;;  %p482_p4 = scmp.lt.u32.totalorder %s480_s24, %s475_s30 }
  0x35   : > { %p478_p12 = pnand %p476_p11, %p447_p3  ;;  %p484_p8 = scmp.lt.u32.totalorder %s475_s30, %s716_s7 }
  0x36   : > { %p483_p5 = por %p482_p4, %p481_p2 }
  0x37   : > { %p479_p10 = pneg %p478_p12 }
  0x38   : > { %p485_p9 = por %p484_p8, %p483_p5 }
  0x3a   : > { %p486_p0 = pnand %p485_p9, %p479_p10 }
  0x3c   : > { %489 = shalt.err (!%p486_p0)
}
  0x3d   : > { %s490_s23 = scalar_lea.vmem %s149_s14, 256  ;;  %s578_s25 = smov [#allocation5]  }
  0x3e   : > { %p491_p1 = scmp.ne.s32.totalorder %s149_s14, %s490_s23  ;;  %s495_s26 = sshll.u32 %s578_s25, 4  ;;  %s496_s26 = int_to_ptr.vmem [resolvable:$false] %s495_s26 }
  0x3f   : > { %s497_s27 = scalar_lea.vmem %s496_s26, 512  ;;  %p498_p6 = scmp.lt.s32.totalorder %s149_s14, %s496_s26 }
  0x40   : > { %p493_p11 = pnand %p491_p1, %p447_p3  ;;  %p499_p7 = scmp.lt.s32.totalorder %s497_s27, %s490_s23 }
  0x42   : > { %p494_p12 = pneg %p493_p11  ;;  %p500_p2 = por %p499_p7, %p498_p6 }
  0x44   : > { %p501_p4 = pnand %p500_p2, %p494_p12 }
  0x46   : > { %504 = shalt.err (!%p501_p4)
}
  0x47   : > { %390 = dma.hbm_to_vmem [thread:$0]  (!%p669_p13), %s716_s7, 256, %s149_s14, %s137_s28  }
  0x48   : > { %p827_p10 = scmp.ne.s32.totalorder %s826_s29, 0 }
  0x49   : > { %s743_s5 = sand.u32 (!%p827_p10), 1, %s567_s10   ;;  %p828_p6 = scmp.ne.s32.totalorder (!%p827_p10), %s820_s20, 0 }
  0x4a   : > { %157 = sbr.rel (%p827_p10) target bundleno = 154 (0x9a), region = 28  ;;  %s746_s6 = sshll.u32 (!%p827_p10), %s743_s5, 4 }
  0x4b   : > { %s160_s8 = scalar_lea.sflag (!%p827_p10), [#allocation3], %s743_s5  ;;  %s163_s30 = scalar_lea.vmem (!%p827_p10), [#allocation2], %s746_s6 }
  0x51   : > { %550 = dma.done.wait (%p828_p6), %s160_s8, 256  }
  0x52   : > { %552 = vsyncadd (%p828_p6), %s160_s8, 4294967040  ;;  %s169_s3 = scalar_lea.sflag [#allocation6], %s743_s5  ;;  %s172_s29 = scalar_lea.vmem [#allocation5], %s746_s6 }
  0x53   : > { %554 = dma.done.wait (%p828_p6), %s169_s3, 256  }
  0x54   : > { %556 = vsyncadd (%p828_p6), %s169_s3, 4294967040  ;;  %v198_v0 = vld [vmem:[%s163_s30] sm:$0xff]  ;;  %v199_v1 = vld [vmem:[%s163_s30 + $0x8] sm:$0xff]  ;;  %v236_v18 = vlaneseq  ;;  %s369_s20 = sshll.u32 %s616_s13, 3  ;;  %s197_s7 = scalar_lea.vmem [#allocation7], %s746_s6 }
  0x55   : > { %v202_v2 = vsub.f32 0.0, %v198_v0  ;;  %v203_v3 = vsub.f32 0.0, %v199_v1  ;;  %v239_v27 = vstv %s369_s20  ;;  %v200_v28 = vld [vmem:[%s172_s29] sm:$0xff]  ;;  %v201_v31 = vld [vmem:[%s172_s29 + $0x8] sm:$0xff]  ;;  %s263_s14 = sshll.u32 %s197_s7, 4  ;;  %s377_s28 = sshll.u32 %s616_s13, 8  ;;  %s767_s14 = int_to_ptr.vmem [resolvable:$true] %s263_s14 }
  0x56   : > { %v237_v23 = vshrl.u32 %v236_v18, 7  ;;  %s772_s24 = scalar_lea.hbm %s816_s2, %s377_s28  ;;  %s249_s17 = scalar_lea.sflag [#allocation4], %s743_s5 }
  0x57   : > { %v204_v4 = vmul.f32 1.442695, %v202_v2  ;;  %v206_v5 = vmul.f32 1.442695, %v203_v3  ;;  %s505_s19 = scalar_lea.vmem %s767_s14, 256  ;;  %p829_p3 = scmp.ne.s32.totalorder %s821_s21, 0 }
  0x58   : > { %v240_v32 = vadd.s32 %v239_v27, %v237_v23  ;;  %p506_p13 = scmp.ne.s32.totalorder %s767_s14, %s505_s19  ;;  %s579_s13 = smov [#allocation7]  }
  0x59   : > { %429 = vpow2.f32 %v204_v4  ;;  %s509_s23 = sshll.u32 %s579_s13, 4  ;;  %s510_s23 = int_to_ptr.vmem [resolvable:$false] %s509_s23 }
  0x5a   : > { %431 = vpow2.f32 %v206_v5  ;;  %vm241_vm0 = vcmp.lt.s32.totalorder %v240_v32, 13  ;;  %p507_p7 = pnand %p506_p13, %p829_p3  ;;  %s511_s25 = scalar_lea.vmem %s510_s23, 512 }
  0x5b   : > { %p512_p8 = scmp.lt.s32.totalorder %s767_s14, %s510_s23  ;;  %p513_p9 = scmp.lt.s32.totalorder %s511_s25, %s505_s19 }
  0x5c   : > { %p508_p5 = pneg %p507_p7 }
  0x5d   : > { %p514_p0 = por %p513_p9, %p512_p8 }
  0x5f   : > { %p515_p1 = pnand %p514_p0, %p508_p5 }
  0x63   : > { %v430_v6 = vpop.eup %429 }
  0x64   : > { %v432_v7 = vpop.eup %431  ;;  %v208_v8 = vadd.f32 1.0, %v430_v6 }
  0x65   : > { %v209_v9 = vadd.f32 1.0, %v432_v7 }
  0x66   : > { %433 = vrcp.f32 %v208_v8 }
  0x67   : > { %435 = vrcp.f32 %v209_v9 }
  0x70   : > { %v434_v10 = vpop.eup %433 }
  0x71   : > { %v436_v11 = vpop.eup %435  ;;  %v214_v12 = vmax.f32 %v434_v10, 1e-08  ;;  %v220_v13 = vsub.f32 1.0, %v434_v10 }
  0x72   : > { %v215_v14 = vmax.f32 %v436_v11, 1e-08  ;;  %v221_v15 = vsub.f32 1.0, %v436_v11 }
  0x73   : > { %437 = vlog2.f32 %v214_v12  ;;  %v222_v16 = vmax.f32 %v220_v13, 1e-08 }
  0x74   : > { %439 = vlog2.f32 %v215_v14  ;;  %v223_v17 = vmax.f32 %v221_v15, 1e-08 }
  0x75   : > { %441 = vlog2.f32 %v222_v16 }
  0x76   : > { %443 = vlog2.f32 %v223_v17 }
  0x7d   : > { %v438_v19 = vpop.eup %437 }
  0x7e   : > { %v440_v20 = vpop.eup %439  ;;  %v217_v21 = vmul.f32 0.6931472, %v438_v19 }
  0x7f   : > { %v442_v22 = vpop.eup %441  ;;  %v219_v24 = vmul.f32 0.6931472, %v440_v20 }
  0x80   : > { %v444_v25 = vpop.eup %443  ;;  %v225_v26 = vmul.f32 0.6931472, %v442_v22 }
  0x81   : > { %v227_v29 = vmul.f32 0.6931472, %v444_v25 }
  0x82   : > { %v228_v30 = vsub.f32 %v217_v21, %v225_v26 }
  0x83   : > { %v229_v33 = vsub.f32 %v219_v24, %v227_v29 }
  0x84   : > { %v230_v34 = vmul.f32 %v228_v30, %v200_v28 }
  0x85   : > { %v231_v35 = vmul.f32 %v229_v33, %v201_v31 }
  0x86   : > { %v232_v36 = vadd.f32 %v230_v34, %v225_v26 }
  0x87   : > { %v233_v37 = vadd.f32 %v231_v35, %v227_v29 }
  0x88   : > { %v234_v38 = vsub.f32 0.0, %v232_v36 }
  0x89   : > { %v235_v39 = vsub.f32 0.0, %v233_v37 }
  0x8a   : > { %v242_v40 = vsel %vm241_vm0, %v234_v38, 0.0 }
  0x8b   : > { %246 = vst [vmem:[%s197_s7] sm:$0xff] %v242_v40  ;;  %v243_v41 = vsel %vm241_vm0, %v235_v39, 0.0 }
  0x8c   : > { %247 = vst [vmem:[%s197_s7 + $0x8] sm:$0xff] %v243_v41 }
  0x8d   : > { %518 = shalt.err (!%p515_p1)
}
  0x8e   : > { %s519_s26 = scalar_lea.hbm %s772_s24, 256  ;;  %s523_s6 = scalar_lea.hbm %s816_s2, 512 }
  0x8f   : > { %p520_p11 = scmp.ne.s32.totalorder %s772_s24, %s519_s26  ;;  %p524_p4 = scmp.lt.u32.totalorder %s772_s24, %s816_s2 }
  0x90   : > { %p525_p10 = scmp.lt.u32.totalorder %s523_s6, %s519_s26  ;;  %p527_p13 = scmp.lt.u32.totalorder %s519_s26, %s772_s24 }
  0x91   : > { %p521_p12 = pnand %p520_p11, %p829_p3 }
  0x92   : > { %p526_p6 = por %p525_p10, %p524_p4 }
  0x93   : > { %p522_p2 = pneg %p521_p12 }
  0x94   : > { %p528_p7 = por %p527_p13, %p526_p6 }
  0x96   : > { %p529_p5 = pnand %p528_p7, %p522_p2 }
  0x98   : > { %532 = shalt.err (!%p529_p5)
}
  0x99   : > { %382 = dma.vmem_to_hbm [thread:$0]  (%p829_p3), %s767_s14, 256, %s772_s24, %s249_s17  }
  0x9a PF: > { %s275_s3 = sand.u32 1, %s563_s9   ;;  %p830_p8 = scmp.ne.s32.totalorder %s822_s22, 0 }
  0x9b   : > { %p831_p9 = scmp.ge.s32.totalorder %s575_s12, 2  ;;  %s276_s29 = scalar_lea.sflag [#allocation4], %s275_s3 }
  0x9d   : > { %p392_p0 = pnand %p831_p9, %p830_p8 }
  0x9f   : > { %558 = dma.done.wait (!%p392_p0), %s276_s29, 256  }
  0xa0   : > { %560 = vsyncadd (!%p392_p0), %s276_s29, 4294967040  ;;  %p18_p1 = scmp.ge.s32.totalorder %s620_s15, 4   ;;  %s832_s9 = smov %s567_s10 }
  0xa1   : > { %s833_s10 = smov %s571_s11  ;;  %s834_s11 = smov %s632_s18 }
  0xa2   : > { %s835_s12 = smov %s620_s15  ;;  %20 = sbr.rel (!%p18_p1) target bundleno = 7 (0x7), region = 86 }
  0xa9   :  { %281 = vsyncpa [#allocation3], 1 }
  0xaa   :  { %283 = vsyncpa [#allocation3 + $0x1], 1 }
  0xab   :  { %284 = vsyncpa [#allocation6], 1 }
  0xac   :  { %286 = vsyncpa [#allocation6 + $0x1], 1 }
  0xad   :  { %287 = vsyncpa [#allocation4], 1 }
  0xae   :  { %289 = vsyncpa [#allocation4 + $0x1], 1 }

</bundles_post_ra>
